<compile_context>
chip_gen: v5e
topology: v5e:2x2
jax: 0.10.0
libtpu: 0.0.40
codegen_flags: <defaults>
</compile_context>

<pallas_src>
import math
import jax
import jax.numpy as jnp
from jax.experimental import pallas as pl
from jax.experimental.pallas import tpu as pltpu


def _proj_kernel(x_ref, w_ref, b_ref, o_ref):
    # x_ref: (tm, p) f32, w_ref: (p, D_pad) f32, b_ref: (1, D_pad) f32,
    # o_ref: (tm, D_pad) out_dtype.  f32 accumulation on the MXU; the bias add
    # and the cast ride free in VPU slots under the memory bottleneck.
    acc = jnp.dot(x_ref[...], w_ref[...], preferred_element_type=jnp.float32)
    o_ref[...] = (acc + b_ref[...]).astype(o_ref.dtype)


def _pick_tm(M, p, D_pad, out_itemsize, vmem_budget_bytes=20 * 1024 * 1024):
    """Pick the row-tile from a VMEM budget (fits v7x's 32 MiB scoped default)."""
    # Double-buffered streamed blocks: input (tm, p) f32 + output (tm, D_pad).
    per_row = 2 * (p * 4 + D_pad * out_itemsize)
    tm = vmem_budget_bytes // per_row
    tm = max(8, min(int(tm), 4096))
    tm -= tm % 8                              # sublane (8) alignment
    m_pad = ((M + 7) // 8) * 8
    tm = min(tm, m_pad)                       # never a block larger than the data
    # v7x has 2 TensorCores: prefer >= 2 parallel grid steps when possible.
    if tm >= m_pad and m_pad >= 16:
        tm = max(8, ((m_pad // 2 + 7) // 8) * 8)
    return tm


def patch_embed_per_channel(x, weight, bias, patch_size, out_dtype=jnp.float32):
    """x: (B, C, T) f32; weight: (D, p); bias: (D,).  Returns (B, C*t, D).

    out_dtype=jnp.bfloat16 is the recommended perf configuration (halves HBM
    write traffic; accumulation stays f32).
    """
    B, C, T = x.shape
    p = patch_size
    assert T % p == 0, "Signal length must be divisible by patch size"
    t = T // p
    D = weight.shape[0]

    M = B * C * t
    patches = x.reshape(M, p)                 # contiguous -> free reshape

    # Lane-dense output: pad D up to a multiple of 128 so output stores are
    # unmasked.  For production embed_dims (multiples of 128) this is a no-op
    # and the wrapper slice below is elided.
    D_pad = max(128, ((D + 127) // 128) * 128)
    w_t = weight.T                            # (p, D)
    b2d = bias.reshape(1, D)                  # (1, D)
    if D_pad != D:
        w_t = jnp.pad(w_t, ((0, 0), (0, D_pad - D)))
        b2d = jnp.pad(b2d, ((0, 0), (0, D_pad - D)))

    out_itemsize = jnp.dtype(out_dtype).itemsize
    tm = _pick_tm(M, p, D_pad, out_itemsize)
    grid = (pl.cdiv(M, tm),)                  # boundary blocks handled by Pallas

    cost = pl.CostEstimate(
        flops=2 * M * p * D_pad,
        transcendentals=0,
        bytes_accessed=(M * p * 4) + (p * D_pad * 4) + (D_pad * 4)
                       + (M * D_pad * out_itemsize),
    )

    out = pl.pallas_call(
        _proj_kernel,
        out_shape=jax.ShapeDtypeStruct((M, D_pad), out_dtype),
        grid_spec=pltpu.PrefetchScalarGridSpec(
            num_scalar_prefetch=0,
            grid=grid,
            in_specs=[
                pl.BlockSpec((tm, p), lambda i: (i, 0)),       # streamed patches
                pl.BlockSpec((p, D_pad), lambda i: (0, 0)),    # resident weight
                pl.BlockSpec((1, D_pad), lambda i: (0, 0)),    # resident bias
            ],
            out_specs=pl.BlockSpec((tm, D_pad), lambda i: (i, 0)),
        ),
        compiler_params=pltpu.CompilerParams(
            dimension_semantics=("parallel",)),
        cost_estimate=cost,
    )(patches, w_t, b2d)

    if D_pad != D:
        out = out[:, :D]
    return out.reshape(B, C * t, D)


def init_params(key, embed_dim, patch_size):
    """Deterministic init mirroring the PyTorch module:
    - weight: Conv2d weight viewed as (D, p), Xavier-uniform re-init.
    - bias:   Conv2d default uniform(-1/sqrt(fan_in), 1/sqrt(fan_in)), fan_in = p.
    """
    kw, kb = jax.random.split(key)
    fan_in, fan_out = patch_size, embed_dim
    bound_w = math.sqrt(6.0 / (fan_in + fan_out))
    weight = jax.random.uniform(kw, (embed_dim, patch_size), jnp.float32,
                                minval=-bound_w, maxval=bound_w)
    bound_b = 1.0 / math.sqrt(patch_size)
    bias = jax.random.uniform(kb, (embed_dim,), jnp.float32,
                              minval=-bound_b, maxval=bound_b)
    return weight, bias


if __name__ == "__main__":
    # Small shapes consistent with the module's waveform branch:
    # img_size (=T) = 16, patch_size = 8, in_chans = 4, embed_dim = 32
    B, C, T = 2, 4, 16
    patch_size = 8
    embed_dim = 32

    key = jax.random.PRNGKey(0)
    kx, kp = jax.random.split(key)
    x = jax.random.normal(kx, (B, C, T), jnp.float32)
    weight, bias = init_params(kp, embed_dim, patch_size)

    # Pure-JAX reference of the same computation (matches the PyTorch module).
    t = T // patch_size
    ref = (x.reshape(B * C * t, patch_size) @ weight.T + bias)
    ref = ref.reshape(B, C * t, embed_dim)

    # 1) Exact-semantics path (f32 output): tight check.
    out_f32 = patch_embed_per_channel(x, weight, bias, patch_size,
                                      out_dtype=jnp.float32)
    out_f32 = jax.block_until_ready(out_f32)
    assert out_f32.shape == (B, C * t, embed_dim)
    assert jnp.allclose(out_f32, ref, atol=1e-5, rtol=1e-5)

    # 2) Recommended perf config (bf16 output, f32 accumulation): loose check.
    out_bf16 = patch_embed_per_channel(x, weight, bias, patch_size,
                                       out_dtype=jnp.bfloat16)
    out_bf16 = jax.block_until_ready(out_bf16)
    assert out_bf16.dtype == jnp.bfloat16
    assert jnp.allclose(out_bf16.astype(jnp.float32), ref, atol=5e-2, rtol=5e-2)

    print("KERNEL_OK")
</pallas_src>

<mosaic_0001>
module attributes {stable_mosaic.version = 11 : i64} {
  func.func @_proj_kernel(%arg0: i32, %arg1: memref<8x8xf32, #tpu.memory_space<vmem>>, %arg2: memref<8x128xf32, #tpu.memory_space<vmem>>, %arg3: memref<1x128xf32, #tpu.memory_space<vmem>>, %arg4: memref<8x128xf32, #tpu.memory_space<vmem>>) attributes {dimension_semantics = [#tpu.dimension_semantics<parallel>], iteration_bounds = array<i64: 2>, scalar_prefetch = 0 : i64, scratch_operands = 0 : i64, tpu.core_type = #tpu.core_type<tc>, window_params = [{transform_indices = @transform_0, window_bounds = array<i64: 8, 8>}, {pipeline_mode = #tpu.pipeline_mode<synchronous>, transform_indices = @transform_1, window_bounds = array<i64: 8, 128>}, {pipeline_mode = #tpu.pipeline_mode<synchronous>, transform_indices = @transform_2, window_bounds = array<i64: 1, 128>}, {transform_indices = @transform_3, window_bounds = array<i64: 8, 128>}]} {
    %c0 = arith.constant 0 : index
    %c0_0 = arith.constant 0 : index
    %0 = vector.load %arg1[%c0, %c0_0] : memref<8x8xf32, #tpu.memory_space<vmem>>, vector<8x8xf32>
    %c0_1 = arith.constant 0 : index
    %c0_2 = arith.constant 0 : index
    %1 = vector.load %arg2[%c0_1, %c0_2] : memref<8x128xf32, #tpu.memory_space<vmem>>, vector<8x128xf32>
    %cst = arith.constant dense<0.000000e+00> : vector<8x128xf32>
    %2 = tpu.matmul %0, %1, %cst {dimension_numbers = #tpu.dot_dimension_numbers<[1], [0], [0], [1], [0, 0, 1, 1], [], []>} : vector<8x8xf32>, vector<8x128xf32>, vector<8x128xf32> -> vector<8x128xf32>
    %c0_3 = arith.constant 0 : index
    %c0_4 = arith.constant 0 : index
    %3 = vector.load %arg3[%c0_3, %c0_4] : memref<1x128xf32, #tpu.memory_space<vmem>>, vector<1x128xf32>
    %4 = vector.broadcast %3 : vector<1x128xf32> to vector<8x128xf32>
    %5 = arith.addf %2, %4 : vector<8x128xf32>
    %c0_5 = arith.constant 0 : index
    %c0_6 = arith.constant 0 : index
    %6 = vector.load %arg4[%c0_5, %c0_6] : memref<8x128xf32, #tpu.memory_space<vmem>>, vector<8x128xf32>
    tpu.vector_store %arg4[%c0_5, %c0_6], %5 {strides = array<i32>} : memref<8x128xf32, #tpu.memory_space<vmem>>, vector<8x128xf32>,
    return
  }
  func.func @transform_0(%arg0: i32) -> (i32, i32) {
    %c0_i32 = arith.constant 0 : i32
    %c0_i32_0 = arith.constant 0 : i32
    return %arg0, %c0_i32 : i32, i32
  }
  func.func @transform_1(%arg0: i32) -> (i32, i32) {
    %c0_i32 = arith.constant 0 : i32
    %c0_i32_0 = arith.constant 0 : i32
    %c0_i32_1 = arith.constant 0 : i32
    return %c0_i32, %c0_i32_0 : i32, i32
  }
  func.func @transform_2(%arg0: i32) -> (i32, i32) {
    %c0_i32 = arith.constant 0 : i32
    %c0_i32_0 = arith.constant 0 : i32
    %c0_i32_1 = arith.constant 0 : i32
    return %c0_i32, %c0_i32_0 : i32, i32
  }
  func.func @transform_3(%arg0: i32) -> (i32, i32) {
    %c0_i32 = arith.constant 0 : i32
    %c0_i32_0 = arith.constant 0 : i32
    return %arg0, %c0_i32 : i32, i32
  }
}

</mosaic_0001>

<bundles_post_ra>
// kernel: tpu_custom_call.1
= control target key start
LH: loop header
LB: loop body
LE: loop exit
PB: predicated region body
PF: predicated region fallthrough
CT: control target
= control target key end

     0   :  { %8 = vsyncpa [#allocation3], 0  ;;  %s498_s0 = inlined_call_operand.vmem [shape: f32[16,8], index: 0, kind: input, shape index: {}]   ;;  %s499_s1 = inlined_call_operand.vmem [shape: f32[8,128], index: 1, kind: input, shape index: {}]   ;;  %s500_s2 = inlined_call_operand.vmem [shape: f32[1,128], index: 2, kind: input, shape index: {}]   ;;  %s501_s3 = inlined_call_operand.hbm [shape: f32[16,128], index: 3, kind: output, shape index: {}]  }
   0x1   :  { %10 = vsyncpa [#allocation3 + $0x1], 0  ;;  %s407_s12 = smov 0   ;;  %s409_s13 = smov 0  }
   0x2   :  { %s411_s14 = smov 0   ;;  %s413_s15 = smov 0  }
   0x3 LB: > { %s428_s16 = sadd.s32 4294967295, %s385_s15   ;;  %s272_s17 = sadd.s32 4294967294, %s385_s15   ;;  %s385_s15 = sphi %s413_s15, %s507_s15   ;;  %s381_s14 = sphi %s411_s14, %s506_s14   ;;  %s377_s13 = sphi %s409_s13, %s505_s13   ;;  %s373_s12 = sphi %s407_s12, %s504_s12  }
   0x4   : > { %s432_s18 = sadd.s32 1, %s385_s15   ;;  %s91_s19 = sadd.s32 1, %s381_s14 }
   0x5   : > { %s88_s20 = ssub.s32 %s385_s15, %s432_s18  ;;  %p101_p0 = scmp.ne.s32.totalorder %s381_s14, %s377_s13 }
   0x6   : > { %p89_p1 = scmp.eq.s32.totalorder %s88_s20, 0  ;;  %p102_p2 = scmp.eq.s32.totalorder %s428_s16, 1 }
   0x7   : > { %p107_p3 = scmp.ne.s32.totalorder %s377_s13, %s373_s12  ;;  %p108_p4 = scmp.eq.s32.totalorder %s272_s17, 1 }
   0x8   : > { %s443_s21 = scalar_select %p89_p1, %s381_s14, %s91_s19  }
   0x9   : > { %p445_p5 = por %p102_p2, %p101_p0  ;;  %p449_p6 = por %p108_p4, %p107_p3 }
   0xa   : > { %p275_p7 = scmp.ge.s32.totalorder %s385_s15, 1  ;;  %p139_p8 = scmp.lt.s32.totalorder %s385_s15, 3 }
   0xc   : > { %p140_p9 = pnand %p275_p7, %p139_p8 }
   0xd   : > { %p162_p10 = scmp.lt.s32.totalorder (!%p140_p9), %s428_s16, 1  ;;  %s159_s4 = sand.u32 (!%p140_p9), 1, %s377_s13  }
   0xe   : > { %143 = sbr.rel (%p140_p9) target bundleno = 155 (0x9b), region = 32  ;;  %s276_s5 = sshll.u32 (!%p140_p9), %s159_s4, 3 }
   0xf   : > { %s280_s6 = sshll.u32 (!%p140_p9), %s428_s16, 3  ;;  %s161_s17 = scalar_lea.vmem (!%p140_p9), [#allocation2], %s276_s5 }
  0x10   : > { %s208_s9 = scalar_lea.hbm (!%p140_p9), %s501_s3, %s280_s6  ;;  %s210_s19 = sshll.u32 (!%p140_p9), %s161_s17, 4  ;;  %s211_s19 = int_to_ptr.vmem [resolvable:$true] %s210_s19 }
  0x11   : > { %s212_s20 = sshll.u32 (!%p140_p9), %s208_s9, 4  ;;  %s198_s24 = scalar_lea.sflag (!%p140_p9), [#allocation3], %s159_s4  ;;  %s213_s20 = int_to_ptr.hbm [resolvable:$true] %s212_s20 }
  0x12   : > { %s337_s25 = sshra.s32 (!%p140_p9), %s213_s20, 4  ;;  %s343_s28 = scalar_lea.hbm (!%p140_p9), %s501_s3, 16  ;;  %s338_s25 = int_to_ptr.hbm [resolvable:$true] %s337_s25 }
  0x13   : > { %v167_v0 = vld [vmem:[%s499_s1] sm:$0xff]  ;;  %s163_s26 = scalar_select %p162_p10, %s428_s16, 1  ;;  %vm172_vm0 = vcmask 64512  }
  0x14   : > { %191 = vmatpush.msra.mxu0 %v167_v0  ;;  %v322_v2 = vld [vmem:[%s500_s2] ss:$0 sm:$0xff]  ;;  %s339_s16 = scalar_lea.hbm %s338_s25, 8  ;;  %p344_p0 = scmp.lt.s32.totalorder %s338_s25, %s501_s3 }
  0x15   : > { %s277_s27 = sshll.u32 %s163_s26, 3  ;;  %p340_p11 = scmp.ne.s32.totalorder %s338_s25, %s339_s16 }
  0x16   : > { %s165_s30 = scalar_lea.vmem %s498_s0, %s277_s27  ;;  %p345_p1 = scmp.lt.s32.totalorder %s343_s28, %s339_s16 }
  0x17   : > { %v166_v1 = vld [vmem:[%s165_s30] sm:$0xff]  ;;  %p341_p12 = pnand %p340_p11, %p445_p5 }
  0x18   : > { %278 = vmatmul.msk.f32.vlgmr.msra.gmra.mxu0 %vm172_vm0, %v166_v1  ;;  %p346_p2 = por %p345_p1, %p344_p0 }
  0x19   : > { %p342_p13 = pneg %p341_p12 }
  0x1b   : > { %p347_p3 = pnand %p346_p2, %p342_p13 }
  0x95   : > { %v193_v3 = vpop.f32.mrf.mxu0 }
  0x96   : > { %v194_v4 = vadd.f32 %v322_v2, %v193_v3 }
  0x98   : > { %196 = vst [vmem:[%s161_s17] sm:$0xff] %v194_v4 }
  0x99   : > { %350 = shalt.err (!%p347_p3)
}
  0x9a   : > { %283 = dma.vmem_to_hbm [thread:$0]  (%p445_p5), %s211_s19, 128, %s213_s20, %s198_s24  }
  0x9b PF: > { %p289_p4 = scmp.ge.s32.totalorder %s385_s15, 2  ;;  %s224_s4 = sand.u32 1, %s373_s12  }
  0x9c   : > { %s225_s5 = scalar_lea.sflag [#allocation3], %s224_s4 }
  0x9d   : > { %p286_p7 = pnand %p289_p4, %p449_p6 }
  0x9f   : > { %p287_p8 = pneg %p286_p7 }
  0xa1   : > { %368 = dma.done.wait (%p287_p8), %s225_s5, 128  }
  0xa2   : > { %370 = vsyncadd (%p287_p8), %s225_s5, 4294967168  ;;  %p13_p9 = scmp.ge.s32.totalorder %s432_s18, 4   ;;  %s504_s12 = smov %s377_s13 }
  0xa3   : > { %s505_s13 = smov %s381_s14  ;;  %s506_s14 = smov %s443_s21 }
  0xa4   : > { %s507_s15 = smov %s432_s18  ;;  %15 = sbr.rel (!%p13_p9) target bundleno = 3 (0x3), region = 67 }
  0xa9   :  { %231 = vsyncpa [#allocation3], 1 }
  0xaa   :  { %233 = vsyncpa [#allocation3 + $0x1], 1 }

</bundles_post_ra>
